<compile_context>
chip_gen: v5e
topology: v5e:2x2
jax: 0.10.0
libtpu: 0.0.40
codegen_flags: <defaults>
</compile_context>

<pallas_src>
import functools

import jax
import jax.numpy as jnp
from jax.experimental import pallas as pl
from jax.experimental.pallas import tpu as pltpu


def _round_up(n, m):
    return ((n + m - 1) // m) * m


def _nicnn_kernel(n_wz, W, x_ref, wx_ref, wz_ref, o_ref):
    """One batch tile of the full NICNN forward.

    x_ref : (W, TB)        transposed, zero/ones-padded input (ones row = bias)
    wx_ref: (n_wx*W, W)    fused x-projection slab (weights + folded biases)
    wz_ref: (n_wz, W, W)   zero-padded wz weights
    o_ref : (1, TB)        lane-dense output row
    """
    x = x_ref[...]                                              # (W, TB) f32

    # One wide MXU pass computes every layer's x-projection (+bias) at once.
    xp = jnp.dot(wx_ref[...], x, preferred_element_type=jnp.float32)  # (n_wx*W, TB)

    # z = wx[0](x); z = 0.5 * (x * z)   (padded rows stay exactly zero)
    z = 0.5 * (x * xp[0:W, :])

    # Hidden LeakyReLU(0.2) stages: z = leaky(wz[l](z) + wx[l+1](x))
    for l in range(n_wz - 1):
        pre = (jnp.dot(wz_ref[l], z, preferred_element_type=jnp.float32)
               + xp[(l + 1) * W:(l + 2) * W, :])
        z = jnp.maximum(pre, 0.2 * pre)                         # LeakyReLU(0.2)

    # y = wz[-1](z) + wx[-1](x); real result lives in row 0.
    y = (jnp.dot(wz_ref[n_wz - 1], z, preferred_element_type=jnp.float32)
         + xp[n_wz * W:(n_wz + 1) * W, :])
    o_ref[...] = y[0:1, :].astype(o_ref.dtype)


def pack_nicnn_params(params, input_dim, hidden_units):
    """Packs PyTorch-layout params into two zero-padded VMEM-friendly slabs."""
    units = list(hidden_units) + [1]
    out_dims = units[1:]                      # wz/wx output widths (last is 1)
    n_wz = len(out_dims)
    n_wx = n_wz + 1
    # Uniform padded width: >= input_dim+1 (ones-row for bias) and every width.
    W = _round_up(max([input_dim + 1] + out_dims), 8)

    # x-projection slab: block l holds wx[l].weight with its bias folded into
    # column `input_dim` (multiplied by the ones-row of the augmented input).
    wx_slab = jnp.zeros((n_wx * W, W), jnp.float32)
    for l, (w, b) in enumerate(params["wx"]):
        odim = w.shape[0]
        r0 = l * W
        wx_slab = wx_slab.at[r0:r0 + odim, 0:input_dim].set(w)
        wx_slab = wx_slab.at[r0:r0 + odim, input_dim].set(b)

    wz_slab = jnp.zeros((n_wz, W, W), jnp.float32)
    for l, w in enumerate(params["wz"]):
        odim, idim = w.shape
        wz_slab = wz_slab.at[l, 0:odim, 0:idim].set(w)

    meta = {"input_dim": input_dim, "W": W, "n_wz": n_wz}
    return wx_slab, wz_slab, meta


def nicnn_forward(x, wx_slab, wz_slab, meta, *, batch_tile=512):
    """Runs the full NICNN forward. Returns (B, 1)."""
    B, D = x.shape
    W = meta["W"]
    n_wz = meta["n_wz"]
    n_wx = n_wz + 1
    assert D == meta["input_dim"]

    # Lane-dense batch tile (multiple of 128); cap so it stays tiny in VMEM on
    # every generation (incl. v7x's 64 MiB physical / 32 MiB scoped default).
    tb = min(_round_up(batch_tile, 128), _round_up(max(B, 1), 128))
    b_pad = _round_up(B, tb)

    # Transposed, width-padded, bias-augmented input: rows [0:D]=x^T, row D=1.
    x_aug = jnp.zeros((W, b_pad), jnp.float32)
    x_aug = x_aug.at[:D, :B].set(x.T.astype(jnp.float32))
    x_aug = x_aug.at[D, :B].set(1.0)

    grid = (b_pad // tb,)
    kernel = functools.partial(_nicnn_kernel, n_wz, W)

    flops = 2 * b_pad * W * W * (n_wx + n_wz)
    bytes_accessed = 4 * (x_aug.size + wx_slab.size + wz_slab.size + b_pad)

    out = pl.pallas_call(
        kernel,
        out_shape=jax.ShapeDtypeStruct((1, b_pad), jnp.float32),
        grid=grid,
        in_specs=[
            pl.BlockSpec((W, tb), lambda i: (0, i)),           # x tile (streamed)
            pl.BlockSpec((n_wx * W, W), lambda i: (0, 0)),     # wx slab (resident)
            pl.BlockSpec((n_wz, W, W), lambda i: (0, 0, 0)),   # wz slab (resident)
        ],
        out_specs=pl.BlockSpec((1, tb), lambda i: (0, i)),     # lane-dense output
        compiler_params=pltpu.CompilerParams(
            dimension_semantics=("parallel",),
            vmem_limit_bytes=32 * 1024 * 1024,
        ),
        cost_estimate=pl.CostEstimate(
            flops=flops, transcendentals=0, bytes_accessed=bytes_accessed),
    )(x_aug, wx_slab, wz_slab)

    return out[0, :B].reshape(B, 1).astype(x.dtype)


def init_nicnn_params(key, input_dim, hidden_units, std=0.1):
    """Deterministic parameter init mirroring NICNN.__init__
    (softplus_W_kernels=False, kernel_init_fxn = N(0, std)). PyTorch layout:
    weights are (out_dim, in_dim)."""
    units = list(hidden_units) + [1]
    out_dims = units[1:]
    in_dims = [input_dim] + out_dims[:-1]

    # wz layers: bias=False, weight = constant(1 / normalization)
    wz = []
    normalization = 1
    for idim, odim in zip(in_dims, out_dims):
        wz.append(jnp.full((odim, idim), 1.0 / normalization, jnp.float32))
        normalization = odim

    # wx[0]: PosDefDense(input_dim, input_dim), weight=eye, bias=0.
    # TODO(synk): PosDefDense source not provided; at eye/zero init it acts as
    # a plain linear layer, which is what we implement here.
    wx = [(jnp.eye(input_dim, dtype=jnp.float32),
           jnp.zeros((input_dim,), jnp.float32))]

    # wx[1:]: Linear(input_dim, odim), bias=0, weight ~ N(0, std).
    keys = jax.random.split(key, len(out_dims))
    for k, odim in zip(keys, out_dims):
        wx.append((std * jax.random.normal(k, (odim, input_dim), jnp.float32),
                   jnp.zeros((odim,), jnp.float32)))

    return {"wz": wz, "wx": wx}


def nicnn_ref(x, params):
    """Pure-JAX reference matching NICNN.forward."""
    wz, wx = params["wz"], params["wx"]
    w0, b0 = wx[0]
    z = x @ w0.T + b0
    z = 0.5 * (x * z)
    for wz_w, (wx_w, wx_b) in zip(wz[:-1], wx[1:-1]):
        pre = z @ wz_w.T + x @ wx_w.T + wx_b
        z = jnp.where(pre >= 0, pre, 0.2 * pre)
    wzL = wz[-1]
    wxL_w, wxL_b = wx[-1]
    return z @ wzL.T + x @ wxL_w.T + wxL_b


if __name__ == "__main__":
    key = jax.random.PRNGKey(0)
    k_x, k_p = jax.random.split(key)

    batch = 8
    input_dim = 16
    hidden_units = [32, 32]   # units = [32, 32, 1] -> one LeakyReLU hidden stage

    x = jax.random.normal(k_x, (batch, input_dim), jnp.float32)
    params = init_nicnn_params(k_p, input_dim, hidden_units, std=0.1)
    wx_slab, wz_slab, meta = pack_nicnn_params(params, input_dim, hidden_units)

    y = nicnn_forward(x, wx_slab, wz_slab, meta)
    y = jax.block_until_ready(y)

    y_ref = nicnn_ref(x, params)
    assert y.shape == (batch, 1), y.shape
    assert jnp.allclose(y, y_ref, atol=1e-5, rtol=1e-5), (y, y_ref)

    print("KERNEL_OK")
</pallas_src>

<mosaic_0001>
module attributes {stable_mosaic.version = 11 : i64} {
  func.func @_nicnn_kernel(%arg0: i32, %arg1: memref<32x128xf32, #tpu.memory_space<vmem>>, %arg2: memref<96x32xf32, #tpu.memory_space<vmem>>, %arg3: memref<2x32x32xf32, #tpu.memory_space<vmem>>, %arg4: memref<1x128xf32, #tpu.memory_space<vmem>>) attributes {dimension_semantics = [#tpu.dimension_semantics<parallel>], iteration_bounds = array<i64: 1>, scalar_prefetch = 0 : i64, scratch_operands = 0 : i64, tpu.core_type = #tpu.core_type<tc>, window_params = [{transform_indices = @transform_0, window_bounds = array<i64: 32, 128>}, {pipeline_mode = #tpu.pipeline_mode<synchronous>, transform_indices = @transform_1, window_bounds = array<i64: 96, 32>}, {pipeline_mode = #tpu.pipeline_mode<synchronous>, transform_indices = @transform_2, window_bounds = array<i64: 2, 32, 32>}, {transform_indices = @transform_3, window_bounds = array<i64: 1, 128>}]} {
    %c0 = arith.constant 0 : index
    %c0_0 = arith.constant 0 : index
    %0 = vector.load %arg1[%c0, %c0_0] : memref<32x128xf32, #tpu.memory_space<vmem>>, vector<32x128xf32>
    %c0_1 = arith.constant 0 : index
    %c0_2 = arith.constant 0 : index
    %1 = vector.load %arg2[%c0_1, %c0_2] : memref<96x32xf32, #tpu.memory_space<vmem>>, vector<96x32xf32>
    %cst = arith.constant dense<0.000000e+00> : vector<96x128xf32>
    %2 = tpu.matmul %1, %0, %cst {dimension_numbers = #tpu.dot_dimension_numbers<[1], [0], [0], [1], [0, 0, 1, 1], [], []>} : vector<96x32xf32>, vector<32x128xf32>, vector<96x128xf32> -> vector<96x128xf32>
    %3 = vector.extract_strided_slice %2 {offsets = [0, 0], sizes = [32, 128], strides = [1, 1]} : vector<96x128xf32> to vector<32x128xf32>
    %4 = arith.mulf %0, %3 : vector<32x128xf32>
    %cst_3 = arith.constant 5.000000e-01 : f32
    %5 = vector.broadcast %cst_3 : f32 to vector<32x128xf32>
    %6 = arith.mulf %5, %4 : vector<32x128xf32>
    %c0_4 = arith.constant 0 : index
    %c0_5 = arith.constant 0 : index
    %c0_6 = arith.constant 0 : index
    %7 = vector.load %arg3[%c0_4, %c0_5, %c0_6] : memref<2x32x32xf32, #tpu.memory_space<vmem>>, vector<1x32x32xf32>
    %8 = vector.shape_cast %7 : vector<1x32x32xf32> to vector<32x32xf32>
    %cst_7 = arith.constant dense<0.000000e+00> : vector<32x128xf32>
    %9 = tpu.matmul %8, %6, %cst_7 {dimension_numbers = #tpu.dot_dimension_numbers<[1], [0], [0], [1], [0, 0, 1, 1], [], []>} : vector<32x32xf32>, vector<32x128xf32>, vector<32x128xf32> -> vector<32x128xf32>
    %10 = vector.extract_strided_slice %2 {offsets = [32, 0], sizes = [32, 128], strides = [1, 1]} : vector<96x128xf32> to vector<32x128xf32>
    %11 = arith.addf %9, %10 : vector<32x128xf32>
    %cst_8 = arith.constant 2.000000e-01 : f32
    %12 = vector.broadcast %cst_8 : f32 to vector<32x128xf32>
    %13 = arith.mulf %12, %11 : vector<32x128xf32>
    %14 = arith.maximumf %11, %13 : vector<32x128xf32>
    %c1 = arith.constant 1 : index
    %c0_9 = arith.constant 0 : index
    %c0_10 = arith.constant 0 : index
    %15 = vector.load %arg3[%c1, %c0_9, %c0_10] : memref<2x32x32xf32, #tpu.memory_space<vmem>>, vector<1x32x32xf32>
    %16 = vector.shape_cast %15 : vector<1x32x32xf32> to vector<32x32xf32>
    %cst_11 = arith.constant dense<0.000000e+00> : vector<32x128xf32>
    %17 = tpu.matmul %16, %14, %cst_11 {dimension_numbers = #tpu.dot_dimension_numbers<[1], [0], [0], [1], [0, 0, 1, 1], [], []>} : vector<32x32xf32>, vector<32x128xf32>, vector<32x128xf32> -> vector<32x128xf32>
    %18 = vector.extract_strided_slice %2 {offsets = [64, 0], sizes = [32, 128], strides = [1, 1]} : vector<96x128xf32> to vector<32x128xf32>
    %19 = arith.addf %17, %18 : vector<32x128xf32>
    %20 = vector.extract_strided_slice %19 {offsets = [0, 0], sizes = [1, 128], strides = [1, 1]} : vector<32x128xf32> to vector<1x128xf32>
    %c0_12 = arith.constant 0 : index
    %c0_13 = arith.constant 0 : index
    %21 = vector.load %arg4[%c0_12, %c0_13] : memref<1x128xf32, #tpu.memory_space<vmem>>, vector<1x128xf32>
    tpu.vector_store %arg4[%c0_12, %c0_13], %20 {strides = array<i32>} : memref<1x128xf32, #tpu.memory_space<vmem>>, vector<1x128xf32>,
    return
  }
  func.func @transform_0(%arg0: i32) -> (i32, i32) {
    %c0_i32 = arith.constant 0 : i32
    %c0_i32_0 = arith.constant 0 : i32
    return %c0_i32, %arg0 : i32, i32
  }
  func.func @transform_1(%arg0: i32) -> (i32, i32) {
    %c0_i32 = arith.constant 0 : i32
    %c0_i32_0 = arith.constant 0 : i32
    %c0_i32_1 = arith.constant 0 : i32
    return %c0_i32, %c0_i32_0 : i32, i32
  }
  func.func @transform_2(%arg0: i32) -> (i32, i32, i32) {
    %c0_i32 = arith.constant 0 : i32
    %c0_i32_0 = arith.constant 0 : i32
    %c0_i32_1 = arith.constant 0 : i32
    %c0_i32_2 = arith.constant 0 : i32
    return %c0_i32, %c0_i32_0, %c0_i32_1 : i32, i32, i32
  }
  func.func @transform_3(%arg0: i32) -> (i32, i32) {
    %c0_i32 = arith.constant 0 : i32
    %c0_i32_0 = arith.constant 0 : i32
    return %c0_i32, %arg0 : i32, i32
  }
}

</mosaic_0001>

<bundles_post_ra>
// kernel: tpu_custom_call.1
= control target key start
LH: loop header
LB: loop body
LE: loop exit
PB: predicated region body
PF: predicated region fallthrough
CT: control target
= control target key end

     0   :  { %s418_s0 = inlined_call_operand.vmem [shape: f32[32,128], index: 0, kind: input, shape index: {}]   ;;  %s419_s1 = inlined_call_operand.vmem [shape: f32[96,32], index: 1, kind: input, shape index: {}]   ;;  %s420_s2 = inlined_call_operand.vmem [shape: f32[2,32,32], index: 2, kind: input, shape index: {}]   ;;  %s421_s3 = inlined_call_operand.hbm [shape: f32[1,128], index: 3, kind: output, shape index: {}]  }
   0x1   :  { %v18_v0 = vld [vmem:[%s418_s0 + $0x18] sm:$0xff]  ;;  %v17_v1 = vld [vmem:[%s418_s0 + $0x10] sm:$0xff]  ;;  %v16_v2 = vld [vmem:[%s418_s0 + $0x8] sm:$0xff] }
   0x2   :  { %80 = vmatpush.msra.mxu0 %v18_v0  ;;  %263 = vmatpush.msra.mxu1 %v18_v0 }
   0x3   :  { %264 = vmatpush.msra.mxu2 %v18_v0  ;;  %265 = vmatpush.msra.mxu3 %v18_v0 }
   0x4   :  { %8 = vsyncpa [#allocation3], 0  ;;  %81 = vmatpush.msra.mxu0 %v17_v1  ;;  %266 = vmatpush.msra.mxu1 %v17_v1  ;;  %v15_v3 = vld [vmem:[%s418_s0] sm:$0xff]  ;;  %vm31_vm0 = vcmask 261120   ;;  %v20_v5 = vld [vmem:[%s419_s1 + $0x8] sm:$0xff]  ;;  %s302_s30 = smov [#allocation2]  }
   0x5   :  { %267 = vmatpush.msra.mxu2 %v17_v1  ;;  %268 = vmatpush.msra.mxu3 %v17_v1  ;;  %v19_v4 = vld [vmem:[%s419_s1] sm:$0xff]  ;;  %v21_v6 = vld [vmem:[%s419_s1 + $0x10] sm:$0xff]  ;;  %v22_v7 = vld [vmem:[%s419_s1 + $0x18] sm:$0xff]  ;;  %s228_s4 = sshll.u32 %s302_s30, 4  ;;  %s230_s7 = sshll.u32 %s421_s3, 4  ;;  %s229_s4 = int_to_ptr.vmem [resolvable:$true] %s228_s4  ;;  %s231_s7 = int_to_ptr.hbm [resolvable:$true] %s230_s7 }
   0x6   :  { %82 = vmatpush.msra.mxu0 %v16_v2  ;;  %269 = vmatpush.msra.mxu1 %v16_v2  ;;  %v24_v8 = vld [vmem:[%s419_s1 + $0x28] sm:$0xff]  ;;  %v23_v10 = vld [vmem:[%s419_s1 + $0x20] sm:$0xff]  ;;  %v25_v12 = vld [vmem:[%s419_s1 + $0x30] sm:$0xff] }
   0x7   :  { %270 = vmatpush.msra.mxu2 %v16_v2  ;;  %271 = vmatpush.msra.mxu3 %v16_v2  ;;  %v26_v14 = vld [vmem:[%s419_s1 + $0x38] sm:$0xff]  ;;  %v126_v24 = vld [vmem:[%s420_s2] sm:$0xff]  ;;  %v127_v25 = vld [vmem:[%s420_s2 + $0x8] sm:$0xff] }
   0x8   :  { %83 = vmatpush.msra.mxu0 %v15_v3  ;;  %272 = vmatpush.msra.mxu1 %v15_v3  ;;  %v128_v26 = vld [vmem:[%s420_s2 + $0x10] sm:$0xff]  ;;  %v129_v27 = vld [vmem:[%s420_s2 + $0x18] sm:$0xff]  ;;  %v27_v30 = vld [vmem:[%s419_s1 + $0x40] sm:$0xff] }
   0x9   :  { %239 = vmatmul.msk.f32.vlgmr.msra.gmra.mxu0 %vm31_vm0, %v19_v4  ;;  %273 = vmatpush.msra.mxu2 %v15_v3  ;;  %v28_v32 = vld [vmem:[%s419_s1 + $0x48] sm:$0xff]  ;;  %v29_v34 = vld [vmem:[%s419_s1 + $0x50] sm:$0xff]  ;;  %v30_v45 = vld [vmem:[%s419_s1 + $0x58] sm:$0xff] }
   0xa   :  { %274 = vmatpush.msra.mxu3 %v15_v3  ;;  %244 = vmatmul.msk.f32.vlgmr.msra.gmra.mxu1 %vm31_vm0, %v24_v8  ;;  %v255_v52 = vld [vmem:[%s420_s2 + $0x20] sm:$0xff]  ;;  %v256_v53 = vld [vmem:[%s420_s2 + $0x28] sm:$0xff]  ;;  %v257_v54 = vld [vmem:[%s420_s2 + $0x30] sm:$0xff] }
   0xb   :  { %245 = vmatmul.msk.f32.vlgmr.msra.gmra.mxu2 %vm31_vm0, %v25_v12  ;;  %246 = vmatmul.msk.f32.vlgmr.msra.gmra.mxu3 %vm31_vm0, %v26_v14  ;;  %v258_v55 = vld [vmem:[%s420_s2 + $0x38] sm:$0xff] }
  0x11   :  { %240 = vmatmul.msk.f32.gmra.mxu0 %vm31_vm0, %v20_v5 }
  0x13   :  { %247 = vmatmul.msk.f32.gmra.mxu3 %vm31_vm0, %v27_v30 }
  0x19   :  { %241 = vmatmul.msk.f32.gmra.mxu0 %vm31_vm0, %v21_v6 }
  0x1b   :  { %248 = vmatmul.msk.f32.gmra.mxu3 %vm31_vm0, %v28_v32 }
  0x21   :  { %242 = vmatmul.msk.f32.gmra.mxu0 %vm31_vm0, %v22_v7 }
  0x23   :  { %249 = vmatmul.msk.f32.gmra.mxu3 %vm31_vm0, %v29_v34 }
  0x29   :  { %243 = vmatmul.msk.f32.gmra.mxu0 %vm31_vm0, %v23_v10 }
  0x2b   :  { %250 = vmatmul.msk.f32.gmra.mxu3 %vm31_vm0, %v30_v45 }
  0x86   :  { %v85_v9 = vpop.f32.mrf.mxu0 }
  0x87   :  { %v118_v20 = vmul.f32 %v85_v9, %v15_v3  ;;  %v100_v28 = vpop.f32.mrf.mxu1 }
  0x89   :  { %v122_v23 = vmul.f32 0.5, %v118_v20 }
  0x8e   :  { %v88_v11 = vpop.f32.mrf.mxu0  ;;  %v103_v35 = vpop.f32.mrf.mxu2 }
  0x8f   :  { %v119_v18 = vmul.f32 %v88_v11, %v16_v2  ;;  %v106_v36 = vpop.f32.mrf.mxu3 }
  0x91   :  { %v123_v22 = vmul.f32 0.5, %v119_v18 }
  0x96   :  { %v91_v13 = vpop.f32.mrf.mxu0 }
  0x97   :  { %v120_v16 = vmul.f32 %v91_v13, %v17_v1  ;;  %v109_v56 = vpop.f32.mrf.mxu3 }
  0x99   :  { %v124_v21 = vmul.f32 0.5, %v120_v16 }
  0x9e   :  { %v94_v15 = vpop.f32.mrf.mxu0 }
  0x9f   :  { %v121_v17 = vmul.f32 %v94_v15, %v18_v0  ;;  %v112_v57 = vpop.f32.mrf.mxu3 }
  0xa1   :  { %v125_v19 = vmul.f32 0.5, %v121_v17 }
  0xa3   :  { %154 = vmatpush.msrb.mxu1 %v125_v19 }
  0xa5   :  { %155 = vmatpush.msrb.mxu1 %v124_v21 }
  0xa6   :  { %v97_v38 = vpop.f32.mrf.mxu0 }
  0xa7   :  { %156 = vmatpush.msrb.mxu1 %v123_v22  ;;  %v114_v58 = vpop.f32.mrf.mxu3 }
  0xa9   :  { %157 = vmatpush.msrb.mxu1 %v122_v23 }
  0xaa   :  { %251 = vmatmul.msk.f32.vlgmr.msrb.gmra.mxu1 %vm31_vm0, %v126_v24 }
  0xaf   :  { %v116_v59 = vpop.f32.mrf.mxu3 }
  0xb2   :  { %252 = vmatmul.msk.f32.gmra.mxu1 %vm31_vm0, %v127_v25 }
  0xba   :  { %253 = vmatmul.msk.f32.gmra.mxu1 %vm31_vm0, %v128_v26 }
  0xc2   :  { %254 = vmatmul.msk.f32.gmra.mxu1 %vm31_vm0, %v129_v27 }
 0x127   :  { %v159_v29 = vpop.f32.mrf.mxu1 }
 0x128   :  { %v160_v42 = vadd.f32 %v159_v29, %v97_v38 }
 0x12a   :  { %v171_v48 = vmul.f32 0.2, %v160_v42 }
 0x12c   :  { %v175_v51 = vmax.f32 %v160_v42, %v171_v48 }
 0x12f   :  { %v162_v31 = vpop.f32.mrf.mxu1 }
 0x130   :  { %v163_v40 = vadd.f32 %v162_v31, %v100_v28 }
 0x132   :  { %v172_v46 = vmul.f32 0.2, %v163_v40 }
 0x134   :  { %v176_v50 = vmax.f32 %v163_v40, %v172_v46 }
 0x137   :  { %v165_v33 = vpop.f32.mrf.mxu1 }
 0x138   :  { %v166_v37 = vadd.f32 %v165_v33, %v103_v35 }
 0x13a   :  { %v173_v43 = vmul.f32 0.2, %v166_v37 }
 0x13c   :  { %v177_v49 = vmax.f32 %v166_v37, %v173_v43 }
 0x13f   :  { %v168_v39 = vpop.f32.mrf.mxu1 }
 0x140   :  { %v169_v41 = vadd.f32 %v168_v39, %v106_v36 }
 0x142   :  { %v174_v44 = vmul.f32 0.2, %v169_v41 }
 0x144   :  { %v178_v47 = vmax.f32 %v169_v41, %v174_v44 }
 0x146   :  { %208 = vmatpush.msrb.mxu2 %v178_v47 }
 0x148   :  { %209 = vmatpush.msrb.mxu2 %v177_v49 }
 0x14a   :  { %210 = vmatpush.msrb.mxu2 %v176_v50 }
 0x14c   :  { %211 = vmatpush.msrb.mxu2 %v175_v51 }
 0x14d   :  { %259 = vmatmul.msk.f32.vlgmr.msrb.gmra.mxu2 %vm31_vm0, %v255_v52 }
 0x155   :  { %260 = vmatmul.msk.f32.gmra.mxu2 %vm31_vm0, %v256_v53 }
 0x15d   :  { %261 = vmatmul.msk.f32.gmra.mxu2 %vm31_vm0, %v257_v54 }
 0x165   :  { %262 = vmatmul.msk.f32.gmra.mxu2 %vm31_vm0, %v258_v55 }
 0x1d0   :  { %v213_v60 = vpop.f32.mrf.mxu2 }
 0x1d1   :  { %v214_v61 = vadd.f32 %v213_v60, %v109_v56 }
 0x1d3   :  { %222 = vst [vmem:[#allocation2] sm:$0x1] %v214_v61 }
 0x1d4   :  { %233 = dma.vmem_to_hbm [thread:$0]  %s229_s4, 16, %s231_s7, [#allocation3]  }
 0x1d8   :  { %v216_v62 = vpop.f32.mrf.mxu2 }
 0x1e0   :  { %v218_v63 = vpop.f32.mrf.mxu2 }
 0x1e8   :  { %v220_v0 = vpop.f32.mrf.mxu2 }
 0x1e9   :  { %300 = dma.done.wait [#allocation3], 16  }
 0x1ea   :  { %301 = vsyncadd [#allocation3], 4294967280 }
 0x1eb   :  { %238 = vsyncpa [#allocation3], 1 }

</bundles_post_ra>
